<compile_context>
chip_gen: v6e
topology: v6e:2x2x1
jax: 0.10.0
libtpu: 0.0.40
codegen_flags: <defaults>
</compile_context>

<pallas_src>
import jax
import jax.numpy as jnp
from jax.experimental import pallas as pl
from jax.experimental.pallas import tpu as pltpu

# ---- Net hyper-params (module defaults: sparse=False, mlp_mult=1.0,
#      dropout=0.0 -> dropout is a no-op in forward) ----
MODEL_DIM = 128
NUM_MLP = 3
MLP_MULT = 1.0
HIDDEN = int(MODEL_DIM * MLP_MULT)
IN_FEATURES = 28 * 28
OUT_FEATURES = 10
OUT_PAD = 128            # lane-dense logits width
LN_EPS = 1e-5            # torch.nn.LayerNorm default eps
NEG_BIG = -1e30
MAX_TILE_B = 1024        # fits every generation's scoped-VMEM with margin
VMEM_LIMIT_BYTES = 32 * 1024 * 1024


def _round_up(n, m):
    return (n + m - 1) // m * m


def _gelu_tanh(x):
    # tanh GELU approximation: 1 EUP tanh + a handful of VALU ops
    # (vs ~15 VALU + exp + recip for the erf rational approximation).
    c = 0.7978845608028654  # sqrt(2/pi)
    return 0.5 * x * (1.0 + jnp.tanh(c * (x + 0.044715 * x * x * x)))


def net_kernel(x_ref, w_in_ref, b_in_ref, w1s_ref, b1s_ref, w2s_ref, b2s_ref,
               w_out_ref, b_out_ref, o_ref):
    # proj_in: cast the f32 tile to bf16 in-register (free VPU op), then
    # (TILE_B, 784) @ (784, D) on the MXU with f32 accumulation.
    x = x_ref[...].astype(jnp.bfloat16)
    h = jnp.dot(x, w_in_ref[...],
                preferred_element_type=jnp.float32) + b_in_ref[...]

    # x = mlp(norm(x)) repeated NUM_MLP times (not residual).
    # LayerNorm affine (gamma/beta) is pre-folded into w1/b1 on the host.
    for i in range(NUM_MLP):
        mu = jnp.mean(h, axis=-1, keepdims=True)
        var = jnp.mean(h * h, axis=-1, keepdims=True) - mu * mu   # one pass
        var = jnp.maximum(var, 0.0)                               # cancellation guard
        hn = (h - mu) * jax.lax.rsqrt(var + LN_EPS)
        z = jnp.dot(hn.astype(jnp.bfloat16), w1s_ref[i],
                    preferred_element_type=jnp.float32) + b1s_ref[i]
        z = _gelu_tanh(z)
        h = jnp.dot(z.astype(jnp.bfloat16), w2s_ref[i],
                    preferred_element_type=jnp.float32) + b2s_ref[i]

    # proj_out, lane-dense: 128 output columns; the 118 padded columns carry a
    # -1e30 bias (and zero weights) so they vanish in the softmax.
    logits = jnp.dot(h.astype(jnp.bfloat16), w_out_ref[...],
                     preferred_element_type=jnp.float32) + b_out_ref[...]
    m = jnp.max(logits, axis=-1, keepdims=True)
    s = logits - m
    lse = jnp.log(jnp.sum(jnp.exp(s), axis=-1, keepdims=True))
    o_ref[...] = s - lse


def prepare_params(params):
    """Host-side prep: fold LayerNorm gamma/beta into the following Linear,
    pad proj_out to 128 lane-dense columns, cast matmul weights to bf16."""
    w1s, b1s = [], []
    for i in range(NUM_MLP):
        gamma = params["gammas"][i].reshape(MODEL_DIM, 1)   # (D, 1)
        beta = params["betas"][i].reshape(1, MODEL_DIM)     # (1, D)
        w1 = params["w1s"][i]                               # (D, H)
        b1 = params["b1s"][i]                               # (1, H)
        w1s.append((gamma * w1).astype(jnp.bfloat16))
        b1s.append((beta @ w1 + b1).astype(jnp.float32))
    w_out_pad = jnp.zeros((MODEL_DIM, OUT_PAD), jnp.float32)
    w_out_pad = w_out_pad.at[:, :OUT_FEATURES].set(params["w_out"])
    b_out_pad = jnp.full((1, OUT_PAD), NEG_BIG, jnp.float32)
    b_out_pad = b_out_pad.at[:, :OUT_FEATURES].set(params["b_out"])
    return (
        params["w_in"].astype(jnp.bfloat16),
        params["b_in"].astype(jnp.float32),
        jnp.stack(w1s),
        jnp.stack(b1s),
        params["w2s"].astype(jnp.bfloat16),
        params["b2s"].astype(jnp.float32),
        w_out_pad.astype(jnp.bfloat16),
        b_out_pad,
    )


def net_forward(x, params, tile_b=None):
    # Glue: the PyTorch `x.view(-1, 28*28)` flatten.  NOTE: no bf16 cast and
    # no jnp.pad here -- both would be an extra HBM pass over x.
    b = x.shape[0]
    x2d = x.reshape(b, IN_FEATURES).astype(jnp.float32)

    if tile_b is None:
        # Aim for >=2 grid programs (v7x megacore) on large batches while
        # amortizing per-step grid overhead; capped so buffers fit VMEM.
        tile_b = min(MAX_TILE_B, max(8, _round_up(pl.cdiv(b, 2), 8)))
    grid = (pl.cdiv(b, tile_b),)   # ragged tail handled by masked boundary block

    kargs = (x2d,) + prepare_params(params)

    const2 = lambda i: (0, 0)
    const3 = lambda i: (0, 0, 0)
    in_specs = [
        pl.BlockSpec((tile_b, IN_FEATURES), lambda i: (i, 0)),   # x tile (f32)
        pl.BlockSpec((IN_FEATURES, MODEL_DIM), const2),          # w_in (bf16)
        pl.BlockSpec((1, MODEL_DIM), const2),                    # b_in (f32)
        pl.BlockSpec((NUM_MLP, MODEL_DIM, HIDDEN), const3),      # w1s (LN-folded)
        pl.BlockSpec((NUM_MLP, 1, HIDDEN), const3),              # b1s (LN-folded)
        pl.BlockSpec((NUM_MLP, HIDDEN, MODEL_DIM), const3),      # w2s
        pl.BlockSpec((NUM_MLP, 1, MODEL_DIM), const3),           # b2s
        pl.BlockSpec((MODEL_DIM, OUT_PAD), const2),              # w_out (padded)
        pl.BlockSpec((1, OUT_PAD), const2),                      # b_out (padded)
    ]
    out = pl.pallas_call(
        net_kernel,
        out_shape=jax.ShapeDtypeStruct((b, OUT_PAD), jnp.float32),
        grid=grid,
        in_specs=in_specs,
        out_specs=pl.BlockSpec((tile_b, OUT_PAD), lambda i: (i, 0)),
        compiler_params=pltpu.CompilerParams(
            dimension_semantics=("parallel",),
            vmem_limit_bytes=VMEM_LIMIT_BYTES),
    )(*kargs)
    return out[:, :OUT_FEATURES]


def init_params(key):
    # Mimic torch defaults: Linear W,b ~ U(-1/sqrt(fan_in), +1/sqrt(fan_in));
    # LayerNorm gamma=1, beta=0.
    def linear(key, fan_in, fan_out):
        k1, k2 = jax.random.split(key)
        bound = 1.0 / jnp.sqrt(float(fan_in))
        w = jax.random.uniform(k1, (fan_in, fan_out), jnp.float32, -bound, bound)
        b = jax.random.uniform(k2, (1, fan_out), jnp.float32, -bound, bound)
        return w, b

    keys = jax.random.split(key, 2 + 2 * NUM_MLP)
    w_in, b_in = linear(keys[0], IN_FEATURES, MODEL_DIM)
    w_out, b_out = linear(keys[1], MODEL_DIM, OUT_FEATURES)
    w1s, b1s, w2s, b2s = [], [], [], []
    for i in range(NUM_MLP):
        w1, b1 = linear(keys[2 + 2 * i], MODEL_DIM, HIDDEN)
        w2, b2 = linear(keys[3 + 2 * i], HIDDEN, MODEL_DIM)
        w1s.append(w1); b1s.append(b1); w2s.append(w2); b2s.append(b2)
    return dict(
        w_in=w_in, b_in=b_in, w_out=w_out, b_out=b_out,
        gammas=jnp.ones((NUM_MLP, 1, MODEL_DIM), jnp.float32),
        betas=jnp.zeros((NUM_MLP, 1, MODEL_DIM), jnp.float32),
        w1s=jnp.stack(w1s), b1s=jnp.stack(b1s),
        w2s=jnp.stack(w2s), b2s=jnp.stack(b2s),
    )


def net_reference(x, p):
    # Pure-JAX f32 reference of the same forward (exact erf GELU, like torch).
    h = x.reshape(x.shape[0], IN_FEATURES).astype(jnp.float32) @ p["w_in"] + p["b_in"]
    for i in range(NUM_MLP):
        mu = jnp.mean(h, -1, keepdims=True)
        var = jnp.mean(jnp.square(h - mu), -1, keepdims=True)
        hn = (h - mu) * jax.lax.rsqrt(var + LN_EPS)
        hn = hn * p["gammas"][i] + p["betas"][i]
        z = jax.nn.gelu(hn @ p["w1s"][i] + p["b1s"][i], approximate=False)
        h = z @ p["w2s"][i] + p["b2s"][i]
    logits = h @ p["w_out"] + p["b_out"]
    return jax.nn.log_softmax(logits, axis=-1)


if __name__ == "__main__":
    key = jax.random.PRNGKey(0)
    k_x, k_p = jax.random.split(key)
    batch = 8                                   # MNIST-shaped NCHW input
    x = jax.random.normal(k_x, (batch, 1, 28, 28), jnp.float32)
    params = init_params(k_p)

    out = jax.block_until_ready(net_forward(x, params))
    ref = net_reference(x, params)

    assert out.shape == (batch, OUT_FEATURES)
    # Kernel uses bf16 matmuls (f32 accumulation) + tanh-GELU (err ~3e-4), so
    # compare against the pure-f32 exact-erf reference with bf16-level tolerance.
    assert jnp.allclose(out, ref, atol=5e-2, rtol=5e-2), "mismatch vs reference"
    print("KERNEL_OK")
</pallas_src>

<mosaic_0001>
module attributes {stable_mosaic.version = 11 : i64} {
  func.func @net_kernel(%arg0: i32, %arg1: memref<8x784xf32, #tpu.memory_space<vmem>>, %arg2: memref<784x128xbf16, #tpu.memory_space<vmem>>, %arg3: memref<1x128xf32, #tpu.memory_space<vmem>>, %arg4: memref<3x128x128xbf16, #tpu.memory_space<vmem>>, %arg5: memref<3x1x128xf32, #tpu.memory_space<vmem>>, %arg6: memref<3x128x128xbf16, #tpu.memory_space<vmem>>, %arg7: memref<3x1x128xf32, #tpu.memory_space<vmem>>, %arg8: memref<128x128xbf16, #tpu.memory_space<vmem>>, %arg9: memref<1x128xf32, #tpu.memory_space<vmem>>, %arg10: memref<8x128xf32, #tpu.memory_space<vmem>>) attributes {dimension_semantics = [#tpu.dimension_semantics<parallel>], iteration_bounds = array<i64: 1>, scalar_prefetch = 0 : i64, scratch_operands = 0 : i64, tpu.core_type = #tpu.core_type<tc>, window_params = [{transform_indices = @transform_0, window_bounds = array<i64: 8, 784>}, {pipeline_mode = #tpu.pipeline_mode<synchronous>, transform_indices = @transform_1, window_bounds = array<i64: 784, 128>}, {pipeline_mode = #tpu.pipeline_mode<synchronous>, transform_indices = @transform_2, window_bounds = array<i64: 1, 128>}, {pipeline_mode = #tpu.pipeline_mode<synchronous>, transform_indices = @transform_3, window_bounds = array<i64: 3, 128, 128>}, {pipeline_mode = #tpu.pipeline_mode<synchronous>, transform_indices = @transform_4, window_bounds = array<i64: 3, 1, 128>}, {pipeline_mode = #tpu.pipeline_mode<synchronous>, transform_indices = @transform_5, window_bounds = array<i64: 3, 128, 128>}, {pipeline_mode = #tpu.pipeline_mode<synchronous>, transform_indices = @transform_6, window_bounds = array<i64: 3, 1, 128>}, {pipeline_mode = #tpu.pipeline_mode<synchronous>, transform_indices = @transform_7, window_bounds = array<i64: 128, 128>}, {pipeline_mode = #tpu.pipeline_mode<synchronous>, transform_indices = @transform_8, window_bounds = array<i64: 1, 128>}, {transform_indices = @transform_9, window_bounds = array<i64: 8, 128>}]} {
    %c0 = arith.constant 0 : index
    %c0_0 = arith.constant 0 : index
    %0 = vector.load %arg1[%c0, %c0_0] : memref<8x784xf32, #tpu.memory_space<vmem>>, vector<8x784xf32>
    %1 = arith.truncf %0 : vector<8x784xf32> to vector<8x784xbf16>
    %c0_1 = arith.constant 0 : index
    %c0_2 = arith.constant 0 : index
    %2 = vector.load %arg2[%c0_1, %c0_2] : memref<784x128xbf16, #tpu.memory_space<vmem>>, vector<784x128xbf16>
    %cst = arith.constant dense<0.000000e+00> : vector<8x128xf32>
    %3 = tpu.matmul %1, %2, %cst {dimension_numbers = #tpu.dot_dimension_numbers<[1], [0], [0], [1], [0, 0, 1, 1], [], []>} : vector<8x784xbf16>, vector<784x128xbf16>, vector<8x128xf32> -> vector<8x128xf32>
    %c0_3 = arith.constant 0 : index
    %c0_4 = arith.constant 0 : index
    %4 = vector.load %arg3[%c0_3, %c0_4] : memref<1x128xf32, #tpu.memory_space<vmem>>, vector<1x128xf32>
    %5 = vector.broadcast %4 : vector<1x128xf32> to vector<8x128xf32>
    %6 = arith.addf %3, %5 : vector<8x128xf32>
    %cst_5 = arith.constant dense<0.000000e+00> : vector<8xf32>
    %7 = vector.multi_reduction <add>, %6, %cst_5 [1] : vector<8x128xf32> to vector<8xf32>
    %8 = vector.shape_cast %7 : vector<8xf32> to vector<8x1xf32>
    %cst_6 = arith.constant 1.280000e+02 : f32
    %9 = vector.broadcast %cst_6 : f32 to vector<8x1xf32>
    %10 = arith.divf %8, %9 : vector<8x1xf32>
    %11 = arith.mulf %6, %6 : vector<8x128xf32>
    %cst_7 = arith.constant dense<0.000000e+00> : vector<8xf32>
    %12 = vector.multi_reduction <add>, %11, %cst_7 [1] : vector<8x128xf32> to vector<8xf32>
    %13 = vector.shape_cast %12 : vector<8xf32> to vector<8x1xf32>
    %cst_8 = arith.constant 1.280000e+02 : f32
    %14 = vector.broadcast %cst_8 : f32 to vector<8x1xf32>
    %15 = arith.divf %13, %14 : vector<8x1xf32>
    %16 = arith.mulf %10, %10 : vector<8x1xf32>
    %17 = arith.subf %15, %16 : vector<8x1xf32>
    %cst_9 = arith.constant 0.000000e+00 : f32
    %18 = vector.broadcast %cst_9 : f32 to vector<8x1xf32>
    %19 = arith.maximumf %17, %18 : vector<8x1xf32>
    %20 = vector.broadcast %10 : vector<8x1xf32> to vector<8x128xf32>
    %21 = arith.subf %6, %20 : vector<8x128xf32>
    %cst_10 = arith.constant 9.99999974E-6 : f32
    %22 = vector.broadcast %cst_10 : f32 to vector<8x1xf32>
    %23 = arith.addf %19, %22 : vector<8x1xf32>
    %24 = math.rsqrt %23 : vector<8x1xf32>
    %25 = vector.broadcast %24 : vector<8x1xf32> to vector<8x128xf32>
    %26 = arith.mulf %21, %25 : vector<8x128xf32>
    %27 = arith.truncf %26 : vector<8x128xf32> to vector<8x128xbf16>
    %c0_11 = arith.constant 0 : index
    %c0_12 = arith.constant 0 : index
    %c0_13 = arith.constant 0 : index
    %28 = vector.load %arg4[%c0_11, %c0_12, %c0_13] : memref<3x128x128xbf16, #tpu.memory_space<vmem>>, vector<1x128x128xbf16>
    %29 = vector.shape_cast %28 : vector<1x128x128xbf16> to vector<128x128xbf16>
    %cst_14 = arith.constant dense<0.000000e+00> : vector<8x128xf32>
    %30 = tpu.matmul %27, %29, %cst_14 {dimension_numbers = #tpu.dot_dimension_numbers<[1], [0], [0], [1], [0, 0, 1, 1], [], []>} : vector<8x128xbf16>, vector<128x128xbf16>, vector<8x128xf32> -> vector<8x128xf32>
    %c0_15 = arith.constant 0 : index
    %c0_16 = arith.constant 0 : index
    %c0_17 = arith.constant 0 : index
    %31 = vector.load %arg5[%c0_15, %c0_16, %c0_17] : memref<3x1x128xf32, #tpu.memory_space<vmem>>, vector<1x1x128xf32>
    %32 = vector.shape_cast %31 : vector<1x1x128xf32> to vector<1x128xf32>
    %33 = vector.broadcast %32 : vector<1x128xf32> to vector<8x128xf32>
    %34 = arith.addf %30, %33 : vector<8x128xf32>
    %cst_18 = arith.constant 5.000000e-01 : f32
    %35 = vector.broadcast %cst_18 : f32 to vector<8x128xf32>
    %36 = arith.mulf %35, %34 : vector<8x128xf32>
    %cst_19 = arith.constant 4.471500e-02 : f32
    %37 = vector.broadcast %cst_19 : f32 to vector<8x128xf32>
    %38 = arith.mulf %37, %34 : vector<8x128xf32>
    %39 = arith.mulf %38, %34 : vector<8x128xf32>
    %40 = arith.mulf %39, %34 : vector<8x128xf32>
    %41 = arith.addf %34, %40 : vector<8x128xf32>
    %cst_20 = arith.constant 0.797884583 : f32
    %42 = vector.broadcast %cst_20 : f32 to vector<8x128xf32>
    %43 = arith.mulf %42, %41 : vector<8x128xf32>
    %44 = math.tanh %43 : vector<8x128xf32>
    %cst_21 = arith.constant 1.000000e+00 : f32
    %45 = vector.broadcast %cst_21 : f32 to vector<8x128xf32>
    %46 = arith.addf %45, %44 : vector<8x128xf32>
    %47 = arith.mulf %36, %46 : vector<8x128xf32>
    %48 = arith.truncf %47 : vector<8x128xf32> to vector<8x128xbf16>
    %c0_22 = arith.constant 0 : index
    %c0_23 = arith.constant 0 : index
    %c0_24 = arith.constant 0 : index
    %49 = vector.load %arg6[%c0_22, %c0_23, %c0_24] : memref<3x128x128xbf16, #tpu.memory_space<vmem>>, vector<1x128x128xbf16>
    %50 = vector.shape_cast %49 : vector<1x128x128xbf16> to vector<128x128xbf16>
    %cst_25 = arith.constant dense<0.000000e+00> : vector<8x128xf32>
    %51 = tpu.matmul %48, %50, %cst_25 {dimension_numbers = #tpu.dot_dimension_numbers<[1], [0], [0], [1], [0, 0, 1, 1], [], []>} : vector<8x128xbf16>, vector<128x128xbf16>, vector<8x128xf32> -> vector<8x128xf32>
    %c0_26 = arith.constant 0 : index
    %c0_27 = arith.constant 0 : index
    %c0_28 = arith.constant 0 : index
    %52 = vector.load %arg7[%c0_26, %c0_27, %c0_28] : memref<3x1x128xf32, #tpu.memory_space<vmem>>, vector<1x1x128xf32>
    %53 = vector.shape_cast %52 : vector<1x1x128xf32> to vector<1x128xf32>
    %54 = vector.broadcast %53 : vector<1x128xf32> to vector<8x128xf32>
    %55 = arith.addf %51, %54 : vector<8x128xf32>
    %cst_29 = arith.constant dense<0.000000e+00> : vector<8xf32>
    %56 = vector.multi_reduction <add>, %55, %cst_29 [1] : vector<8x128xf32> to vector<8xf32>
    %57 = vector.shape_cast %56 : vector<8xf32> to vector<8x1xf32>
    %cst_30 = arith.constant 1.280000e+02 : f32
    %58 = vector.broadcast %cst_30 : f32 to vector<8x1xf32>
    %59 = arith.divf %57, %58 : vector<8x1xf32>
    %60 = arith.mulf %55, %55 : vector<8x128xf32>
    %cst_31 = arith.constant dense<0.000000e+00> : vector<8xf32>
    %61 = vector.multi_reduction <add>, %60, %cst_31 [1] : vector<8x128xf32> to vector<8xf32>
    %62 = vector.shape_cast %61 : vector<8xf32> to vector<8x1xf32>
    %cst_32 = arith.constant 1.280000e+02 : f32
    %63 = vector.broadcast %cst_32 : f32 to vector<8x1xf32>
    %64 = arith.divf %62, %63 : vector<8x1xf32>
    %65 = arith.mulf %59, %59 : vector<8x1xf32>
    %66 = arith.subf %64, %65 : vector<8x1xf32>
    %cst_33 = arith.constant 0.000000e+00 : f32
    %67 = vector.broadcast %cst_33 : f32 to vector<8x1xf32>
    %68 = arith.maximumf %66, %67 : vector<8x1xf32>
    %69 = vector.broadcast %59 : vector<8x1xf32> to vector<8x128xf32>
    %70 = arith.subf %55, %69 : vector<8x128xf32>
    %cst_34 = arith.constant 9.99999974E-6 : f32
    %71 = vector.broadcast %cst_34 : f32 to vector<8x1xf32>
    %72 = arith.addf %68, %71 : vector<8x1xf32>
    %73 = math.rsqrt %72 : vector<8x1xf32>
    %74 = vector.broadcast %73 : vector<8x1xf32> to vector<8x128xf32>
    %75 = arith.mulf %70, %74 : vector<8x128xf32>
    %76 = arith.truncf %75 : vector<8x128xf32> to vector<8x128xbf16>
    %c1 = arith.constant 1 : index
    %c0_35 = arith.constant 0 : index
    %c0_36 = arith.constant 0 : index
    %77 = vector.load %arg4[%c1, %c0_35, %c0_36] : memref<3x128x128xbf16, #tpu.memory_space<vmem>>, vector<1x128x128xbf16>
    %78 = vector.shape_cast %77 : vector<1x128x128xbf16> to vector<128x128xbf16>
    %cst_37 = arith.constant dense<0.000000e+00> : vector<8x128xf32>
    %79 = tpu.matmul %76, %78, %cst_37 {dimension_numbers = #tpu.dot_dimension_numbers<[1], [0], [0], [1], [0, 0, 1, 1], [], []>} : vector<8x128xbf16>, vector<128x128xbf16>, vector<8x128xf32> -> vector<8x128xf32>
    %c1_38 = arith.constant 1 : index
    %c0_39 = arith.constant 0 : index
    %c0_40 = arith.constant 0 : index
    %80 = vector.load %arg5[%c1_38, %c0_39, %c0_40] : memref<3x1x128xf32, #tpu.memory_space<vmem>>, vector<1x1x128xf32>
    %81 = vector.shape_cast %80 : vector<1x1x128xf32> to vector<1x128xf32>
    %82 = vector.broadcast %81 : vector<1x128xf32> to vector<8x128xf32>
    %83 = arith.addf %79, %82 : vector<8x128xf32>
    %cst_41 = arith.constant 5.000000e-01 : f32
    %84 = vector.broadcast %cst_41 : f32 to vector<8x128xf32>
    %85 = arith.mulf %84, %83 : vector<8x128xf32>
    %cst_42 = arith.constant 4.471500e-02 : f32
    %86 = vector.broadcast %cst_42 : f32 to vector<8x128xf32>
    %87 = arith.mulf %86, %83 : vector<8x128xf32>
    %88 = arith.mulf %87, %83 : vector<8x128xf32>
    %89 = arith.mulf %88, %83 : vector<8x128xf32>
    %90 = arith.addf %83, %89 : vector<8x128xf32>
    %cst_43 = arith.constant 0.797884583 : f32
    %91 = vector.broadcast %cst_43 : f32 to vector<8x128xf32>
    %92 = arith.mulf %91, %90 : vector<8x128xf32>
    %93 = math.tanh %92 : vector<8x128xf32>
    %cst_44 = arith.constant 1.000000e+00 : f32
    %94 = vector.broadcast %cst_44 : f32 to vector<8x128xf32>
    %95 = arith.addf %94, %93 : vector<8x128xf32>
    %96 = arith.mulf %85, %95 : vector<8x128xf32>
    %97 = arith.truncf %96 : vector<8x128xf32> to vector<8x128xbf16>
    %c1_45 = arith.constant 1 : index
    %c0_46 = arith.constant 0 : index
    %c0_47 = arith.constant 0 : index
    %98 = vector.load %arg6[%c1_45, %c0_46, %c0_47] : memref<3x128x128xbf16, #tpu.memory_space<vmem>>, vector<1x128x128xbf16>
    %99 = vector.shape_cast %98 : vector<1x128x128xbf16> to vector<128x128xbf16>
    %cst_48 = arith.constant dense<0.000000e+00> : vector<8x128xf32>
    %100 = tpu.matmul %97, %99, %cst_48 {dimension_numbers = #tpu.dot_dimension_numbers<[1], [0], [0], [1], [0, 0, 1, 1], [], []>} : vector<8x128xbf16>, vector<128x128xbf16>, vector<8x128xf32> -> vector<8x128xf32>
    %c1_49 = arith.constant 1 : index
    %c0_50 = arith.constant 0 : index
    %c0_51 = arith.constant 0 : index
    %101 = vector.load %arg7[%c1_49, %c0_50, %c0_51] : memref<3x1x128xf32, #tpu.memory_space<vmem>>, vector<1x1x128xf32>
    %102 = vector.shape_cast %101 : vector<1x1x128xf32> to vector<1x128xf32>
    %103 = vector.broadcast %102 : vector<1x128xf32> to vector<8x128xf32>
    %104 = arith.addf %100, %103 : vector<8x128xf32>
    %cst_52 = arith.constant dense<0.000000e+00> : vector<8xf32>
    %105 = vector.multi_reduction <add>, %104, %cst_52 [1] : vector<8x128xf32> to vector<8xf32>
    %106 = vector.shape_cast %105 : vector<8xf32> to vector<8x1xf32>
    %cst_53 = arith.constant 1.280000e+02 : f32
    %107 = vector.broadcast %cst_53 : f32 to vector<8x1xf32>
    %108 = arith.divf %106, %107 : vector<8x1xf32>
    %109 = arith.mulf %104, %104 : vector<8x128xf32>
    %cst_54 = arith.constant dense<0.000000e+00> : vector<8xf32>
    %110 = vector.multi_reduction <add>, %109, %cst_54 [1] : vector<8x128xf32> to vector<8xf32>
    %111 = vector.shape_cast %110 : vector<8xf32> to vector<8x1xf32>
    %cst_55 = arith.constant 1.280000e+02 : f32
    %112 = vector.broadcast %cst_55 : f32 to vector<8x1xf32>
    %113 = arith.divf %111, %112 : vector<8x1xf32>
    %114 = arith.mulf %108, %108 : vector<8x1xf32>
    %115 = arith.subf %113, %114 : vector<8x1xf32>
    %cst_56 = arith.constant 0.000000e+00 : f32
    %116 = vector.broadcast %cst_56 : f32 to vector<8x1xf32>
    %117 = arith.maximumf %115, %116 : vector<8x1xf32>
    %118 = vector.broadcast %108 : vector<8x1xf32> to vector<8x128xf32>
    %119 = arith.subf %104, %118 : vector<8x128xf32>
    %cst_57 = arith.constant 9.99999974E-6 : f32
    %120 = vector.broadcast %cst_57 : f32 to vector<8x1xf32>
    %121 = arith.addf %117, %120 : vector<8x1xf32>
    %122 = math.rsqrt %121 : vector<8x1xf32>
    %123 = vector.broadcast %122 : vector<8x1xf32> to vector<8x128xf32>
    %124 = arith.mulf %119, %123 : vector<8x128xf32>
    %125 = arith.truncf %124 : vector<8x128xf32> to vector<8x128xbf16>
    %c2 = arith.constant 2 : index
    %c0_58 = arith.constant 0 : index
    %c0_59 = arith.constant 0 : index
    %126 = vector.load %arg4[%c2, %c0_58, %c0_59] : memref<3x128x128xbf16, #tpu.memory_space<vmem>>, vector<1x128x128xbf16>
    %127 = vector.shape_cast %126 : vector<1x128x128xbf16> to vector<128x128xbf16>
    %cst_60 = arith.constant dense<0.000000e+00> : vector<8x128xf32>
    %128 = tpu.matmul %125, %127, %cst_60 {dimension_numbers = #tpu.dot_dimension_numbers<[1], [0], [0], [1], [0, 0, 1, 1], [], []>} : vector<8x128xbf16>, vector<128x128xbf16>, vector<8x128xf32> -> vector<8x128xf32>
    %c2_61 = arith.constant 2 : index
    %c0_62 = arith.constant 0 : index
    %c0_63 = arith.constant 0 : index
    %129 = vector.load %arg5[%c2_61, %c0_62, %c0_63] : memref<3x1x128xf32, #tpu.memory_space<vmem>>, vector<1x1x128xf32>
    %130 = vector.shape_cast %129 : vector<1x1x128xf32> to vector<1x128xf32>
    %131 = vector.broadcast %130 : vector<1x128xf32> to vector<8x128xf32>
    %132 = arith.addf %128, %131 : vector<8x128xf32>
    %cst_64 = arith.constant 5.000000e-01 : f32
    %133 = vector.broadcast %cst_64 : f32 to vector<8x128xf32>
    %134 = arith.mulf %133, %132 : vector<8x128xf32>
    %cst_65 = arith.constant 4.471500e-02 : f32
    %135 = vector.broadcast %cst_65 : f32 to vector<8x128xf32>
    %136 = arith.mulf %135, %132 : vector<8x128xf32>
    %137 = arith.mulf %136, %132 : vector<8x128xf32>
    %138 = arith.mulf %137, %132 : vector<8x128xf32>
    %139 = arith.addf %132, %138 : vector<8x128xf32>
    %cst_66 = arith.constant 0.797884583 : f32
    %140 = vector.broadcast %cst_66 : f32 to vector<8x128xf32>
    %141 = arith.mulf %140, %139 : vector<8x128xf32>
    %142 = math.tanh %141 : vector<8x128xf32>
    %cst_67 = arith.constant 1.000000e+00 : f32
    %143 = vector.broadcast %cst_67 : f32 to vector<8x128xf32>
    %144 = arith.addf %143, %142 : vector<8x128xf32>
    %145 = arith.mulf %134, %144 : vector<8x128xf32>
    %146 = arith.truncf %145 : vector<8x128xf32> to vector<8x128xbf16>
    %c2_68 = arith.constant 2 : index
    %c0_69 = arith.constant 0 : index
    %c0_70 = arith.constant 0 : index
    %147 = vector.load %arg6[%c2_68, %c0_69, %c0_70] : memref<3x128x128xbf16, #tpu.memory_space<vmem>>, vector<1x128x128xbf16>
    %148 = vector.shape_cast %147 : vector<1x128x128xbf16> to vector<128x128xbf16>
    %cst_71 = arith.constant dense<0.000000e+00> : vector<8x128xf32>
    %149 = tpu.matmul %146, %148, %cst_71 {dimension_numbers = #tpu.dot_dimension_numbers<[1], [0], [0], [1], [0, 0, 1, 1], [], []>} : vector<8x128xbf16>, vector<128x128xbf16>, vector<8x128xf32> -> vector<8x128xf32>
    %c2_72 = arith.constant 2 : index
    %c0_73 = arith.constant 0 : index
    %c0_74 = arith.constant 0 : index
    %150 = vector.load %arg7[%c2_72, %c0_73, %c0_74] : memref<3x1x128xf32, #tpu.memory_space<vmem>>, vector<1x1x128xf32>
    %151 = vector.shape_cast %150 : vector<1x1x128xf32> to vector<1x128xf32>
    %152 = vector.broadcast %151 : vector<1x128xf32> to vector<8x128xf32>
    %153 = arith.addf %149, %152 : vector<8x128xf32>
    %154 = arith.truncf %153 : vector<8x128xf32> to vector<8x128xbf16>
    %c0_75 = arith.constant 0 : index
    %c0_76 = arith.constant 0 : index
    %155 = vector.load %arg8[%c0_75, %c0_76] : memref<128x128xbf16, #tpu.memory_space<vmem>>, vector<128x128xbf16>
    %cst_77 = arith.constant dense<0.000000e+00> : vector<8x128xf32>
    %156 = tpu.matmul %154, %155, %cst_77 {dimension_numbers = #tpu.dot_dimension_numbers<[1], [0], [0], [1], [0, 0, 1, 1], [], []>} : vector<8x128xbf16>, vector<128x128xbf16>, vector<8x128xf32> -> vector<8x128xf32>
    %c0_78 = arith.constant 0 : index
    %c0_79 = arith.constant 0 : index
    %157 = vector.load %arg9[%c0_78, %c0_79] : memref<1x128xf32, #tpu.memory_space<vmem>>, vector<1x128xf32>
    %158 = vector.broadcast %157 : vector<1x128xf32> to vector<8x128xf32>
    %159 = arith.addf %156, %158 : vector<8x128xf32>
    %cst_80 = arith.constant dense<0xFF800000> : vector<8xf32>
    %160 = vector.multi_reduction <maximumf>, %159, %cst_80 [1] : vector<8x128xf32> to vector<8xf32>
    %161 = vector.shape_cast %160 : vector<8xf32> to vector<8x1xf32>
    %162 = vector.broadcast %161 : vector<8x1xf32> to vector<8x128xf32>
    %163 = arith.subf %159, %162 : vector<8x128xf32>
    %164 = math.exp %163 : vector<8x128xf32>
    %cst_81 = arith.constant dense<0.000000e+00> : vector<8xf32>
    %165 = vector.multi_reduction <add>, %164, %cst_81 [1] : vector<8x128xf32> to vector<8xf32>
    %166 = vector.shape_cast %165 : vector<8xf32> to vector<8x1xf32>
    %167 = math.log %166 : vector<8x1xf32>
    %168 = vector.broadcast %167 : vector<8x1xf32> to vector<8x128xf32>
    %169 = arith.subf %163, %168 : vector<8x128xf32>
    %c0_82 = arith.constant 0 : index
    %c0_83 = arith.constant 0 : index
    %170 = vector.load %arg10[%c0_82, %c0_83] : memref<8x128xf32, #tpu.memory_space<vmem>>, vector<8x128xf32>
    tpu.vector_store %arg10[%c0_82, %c0_83], %169 {strides = array<i32>} : memref<8x128xf32, #tpu.memory_space<vmem>>, vector<8x128xf32>,
    return
  }
  func.func @transform_0(%arg0: i32) -> (i32, i32) {
    %c0_i32 = arith.constant 0 : i32
    %c0_i32_0 = arith.constant 0 : i32
    return %arg0, %c0_i32 : i32, i32
  }
  func.func @transform_1(%arg0: i32) -> (i32, i32) {
    %c0_i32 = arith.constant 0 : i32
    %c0_i32_0 = arith.constant 0 : i32
    %c0_i32_1 = arith.constant 0 : i32
    return %c0_i32, %c0_i32_0 : i32, i32
  }
  func.func @transform_2(%arg0: i32) -> (i32, i32) {
    %c0_i32 = arith.constant 0 : i32
    %c0_i32_0 = arith.constant 0 : i32
    %c0_i32_1 = arith.constant 0 : i32
    return %c0_i32, %c0_i32_0 : i32, i32
  }
  func.func @transform_3(%arg0: i32) -> (i32, i32, i32) {
    %c0_i32 = arith.constant 0 : i32
    %c0_i32_0 = arith.constant 0 : i32
    %c0_i32_1 = arith.constant 0 : i32
    %c0_i32_2 = arith.constant 0 : i32
    return %c0_i32, %c0_i32_0, %c0_i32_1 : i32, i32, i32
  }
  func.func @transform_4(%arg0: i32) -> (i32, i32, i32) {
    %c0_i32 = arith.constant 0 : i32
    %c0_i32_0 = arith.constant 0 : i32
    %c0_i32_1 = arith.constant 0 : i32
    %c0_i32_2 = arith.constant 0 : i32
    return %c0_i32, %c0_i32_0, %c0_i32_1 : i32, i32, i32
  }
  func.func @transform_5(%arg0: i32) -> (i32, i32, i32) {
    %c0_i32 = arith.constant 0 : i32
    %c0_i32_0 = arith.constant 0 : i32
    %c0_i32_1 = arith.constant 0 : i32
    %c0_i32_2 = arith.constant 0 : i32
    return %c0_i32, %c0_i32_0, %c0_i32_1 : i32, i32, i32
  }
  func.func @transform_6(%arg0: i32) -> (i32, i32, i32) {
    %c0_i32 = arith.constant 0 : i32
    %c0_i32_0 = arith.constant 0 : i32
    %c0_i32_1 = arith.constant 0 : i32
    %c0_i32_2 = arith.constant 0 : i32
    return %c0_i32, %c0_i32_0, %c0_i32_1 : i32, i32, i32
  }
  func.func @transform_7(%arg0: i32) -> (i32, i32) {
    %c0_i32 = arith.constant 0 : i32
    %c0_i32_0 = arith.constant 0 : i32
    %c0_i32_1 = arith.constant 0 : i32
    return %c0_i32, %c0_i32_0 : i32, i32
  }
  func.func @transform_8(%arg0: i32) -> (i32, i32) {
    %c0_i32 = arith.constant 0 : i32
    %c0_i32_0 = arith.constant 0 : i32
    %c0_i32_1 = arith.constant 0 : i32
    return %c0_i32, %c0_i32_0 : i32, i32
  }
  func.func @transform_9(%arg0: i32) -> (i32, i32) {
    %c0_i32 = arith.constant 0 : i32
    %c0_i32_0 = arith.constant 0 : i32
    return %arg0, %c0_i32 : i32, i32
  }
}

</mosaic_0001>

<bundles_post_ra>
// kernel: tpu_custom_call.1
= control target key start
LH: loop header
LB: loop body
LE: loop exit
PB: predicated region body
PF: predicated region fallthrough
CT: control target
= control target key end

     0   :  { %14 = vsyncpa [#allocation3], 0  ;;  %s2408_s0 = inlined_call_operand.hbm [shape: f32[8,784], index: 0, kind: input, shape index: {}]   ;;  %s2409_s1 = inlined_call_operand.hbm [shape: bf16[784,128], index: 1, kind: input, shape index: {}]   ;;  %s2410_s2 = inlined_call_operand.vmem [shape: f32[1,128], index: 2, kind: input, shape index: {}]   ;;  %s2411_s3 = inlined_call_operand.hbm [shape: bf16[3,128,128], index: 3, kind: input, shape index: {}]   ;;  %s2412_s4 = inlined_call_operand.vmem [shape: f32[3,1,128], index: 4, kind: input, shape index: {}]   ;;  %s2413_s5 = inlined_call_operand.hbm [shape: bf16[3,128,128], index: 5, kind: input, shape index: {}]   ;;  %s2414_s6 = inlined_call_operand.vmem [shape: f32[3,1,128], index: 6, kind: input, shape index: {}]   ;;  %s2415_s7 = inlined_call_operand.hbm [shape: bf16[128,128], index: 7, kind: input, shape index: {}]   ;;  %s2416_s8 = inlined_call_operand.vmem [shape: f32[1,128], index: 8, kind: input, shape index: {}]   ;;  %s2417_s9 = inlined_call_operand.hbm [shape: f32[8,128], index: 9, kind: output, shape index: {}]  }
   0x1   :  { %15 = vsyncpa [#allocation6], 0 }
   0x2   :  { %16 = vsyncpa [#allocation9], 0 }
   0x3   :  { %17 = vsyncpa [#allocation4], 0  ;;  %s2221_s30 = smov [#allocation5]  }
   0x4   :  { %s33_s10 = sshll.u32 %s2221_s30, 4  ;;  %s34_s10 = int_to_ptr.vmem [resolvable:$true] %s33_s10 }
   0x5   :  { %s2101_s11 = scalar_lea.vmem %s34_s10, 6272  ;;  %p2106_p1 = scmp.lt.s32.totalorder %s34_s10, %s34_s10 }
   0x6   :  { %p2102_p0 = scmp.ne.s32.totalorder %s34_s10, %s2101_s11  ;;  %p2107_p2 = scmp.lt.s32.totalorder %s2101_s11, %s2101_s11 }
   0x8   :  { %p2108_p3 = por %p2107_p2, %p2106_p1 }
   0xa   :  { %p2109_p4 = pnand %p2108_p3, %p2102_p0 }
   0xc   :  { %2112 = shalt.err (!%p2109_p4)
}
   0xd   :  { %s2222_s12 = smov 64   ;;  %s2223_s13 = smov 4  }
   0xe   :  { %39 = dma.hbm_to_vmem [thread:$0]  %s2409_s1, 6272, %s34_s10, [#allocation6], %s2222_s12, %s2222_s12, %s2223_s13  }
   0xf   :  { %s2224_s16 = smov [#allocation8]   ;;  %s2225_s18 = smov [#allocation2]  }
  0x10   :  { %s61_s17 = sshll.u32 %s2224_s16, 4  ;;  %s24_s19 = sshll.u32 %s2225_s18, 4  ;;  %s62_s17 = int_to_ptr.vmem [resolvable:$true] %s61_s17  ;;  %s25_s19 = int_to_ptr.vmem [resolvable:$true] %s24_s19 }
  0x11   :  { %s2121_s20 = scalar_lea.vmem %s62_s17, 3072  ;;  %p2126_p6 = scmp.lt.s32.totalorder %s62_s17, %s62_s17 }
  0x12   :  { %p2122_p5 = scmp.ne.s32.totalorder %s62_s17, %s2121_s20  ;;  %p2127_p7 = scmp.lt.s32.totalorder %s2121_s20, %s2121_s20 }
  0x14   :  { %p2128_p8 = por %p2127_p7, %p2126_p6 }
  0x16   :  { %p2129_p9 = pnand %p2128_p8, %p2122_p5 }
  0x18   :  { %2132 = shalt.err (!%p2129_p9)
}
  0x19   :  { %67 = dma.hbm_to_vmem [thread:$0]  %s2413_s5, 3072, %s62_s17, [#allocation9], %s2222_s12, %s2222_s12, %s2223_s13  }
  0x1a   :  { %s2141_s1 = scalar_lea.vmem %s25_s19, 896  ;;  %p2146_p11 = scmp.lt.s32.totalorder %s25_s19, %s25_s19 }
  0x1b   :  { %p2142_p10 = scmp.ne.s32.totalorder %s25_s19, %s2141_s1  ;;  %p2147_p12 = scmp.lt.s32.totalorder %s2141_s1, %s2141_s1 }
  0x1d   :  { %p2148_p13 = por %p2147_p12, %p2146_p11 }
  0x1f   :  { %p2149_p0 = pnand %p2148_p13, %p2142_p10 }
  0x21   :  { %2152 = shalt.err (!%p2149_p0)
}
  0x22   :  { %27 = dma.hbm_to_vmem [thread:$0]  %s2408_s0, 896, %s25_s19, [#allocation3]  }
  0x23   :  { %s2226_s25 = smov [#allocation7]   ;;  %s2227_s27 = smov [#allocation10]  }
  0x24   :  { %s47_s26 = sshll.u32 %s2226_s25, 4  ;;  %s75_s28 = sshll.u32 %s2227_s27, 4  ;;  %s48_s26 = int_to_ptr.vmem [resolvable:$true] %s47_s26  ;;  %s76_s28 = int_to_ptr.vmem [resolvable:$true] %s75_s28 }
  0x25   :  { %s2161_s29 = scalar_lea.vmem %s48_s26, 3072  ;;  %p2166_p2 = scmp.lt.s32.totalorder %s48_s26, %s48_s26 }
  0x26   :  { %p2162_p1 = scmp.ne.s32.totalorder %s48_s26, %s2161_s29  ;;  %p2167_p3 = scmp.lt.s32.totalorder %s2161_s29, %s2161_s29 }
  0x28   :  { %p2168_p4 = por %p2167_p3, %p2166_p2 }
  0x2a   :  { %p2169_p5 = pnand %p2168_p4, %p2162_p1 }
  0x2c   :  { %2172 = shalt.err (!%p2169_p5)
}
  0x2d   :  { %53 = dma.hbm_to_vmem [thread:$0]  %s2411_s3, 3072, %s48_s26, [#allocation6], %s2222_s12, %s2222_s12, %s2223_s13  }
  0x2e   :  { %s2181_s0 = scalar_lea.vmem %s76_s28, 1024  ;;  %p2186_p7 = scmp.lt.s32.totalorder %s76_s28, %s76_s28 }
  0x2f   :  { %p2182_p6 = scmp.ne.s32.totalorder %s76_s28, %s2181_s0  ;;  %p2187_p8 = scmp.lt.s32.totalorder %s2181_s0, %s2181_s0 }
  0x31   :  { %p2188_p9 = por %p2187_p8, %p2186_p7 }
  0x33   :  { %p2189_p10 = pnand %p2188_p9, %p2182_p6 }
  0x35   :  { %2192 = shalt.err (!%p2189_p10)
}
  0x36   :  { %81 = dma.hbm_to_vmem [thread:$0]  %s2415_s7, 1024, %s76_s28, [#allocation9], %s2222_s12, %s2222_s12, %s2223_s13  }
  0x37   :  { %2213 = dma.done.wait [#allocation3], 896  }
  0x38   :  { %2214 = vsyncadd [#allocation3], 4294966400 }
  0x39   :  { %2215 = dma.done.wait [#allocation6], 9344  }
  0x3a   :  { %2216 = vsyncadd [#allocation6], 4294957952 }
  0x3b   :  { %2217 = dma.done.wait [#allocation9], 4096  }
  0x3c   :  { %2218 = vsyncadd [#allocation9], 4294963200  ;;  %v1972_v0 = vld [vmem:[#allocation5 + $0x78] sm:$0xff]   ;;  %v1976_v4 = vld [vmem:[#allocation5 + $0x70] sm:$0xff]   ;;  %v2228_v44 = vmov 0.0   ;;  %vm2229_vm0 = vmmov 0  }
  0x3d   :  { %v1973_v1 = vld [vmem:[#allocation5 + $0x38] sm:$0xff]   ;;  %1685 = vmatprep.subr.bf16.mxu0 %v1972_v0  ;;  %v1977_v5 = vld [vmem:[#allocation5 + $0x30] sm:$0xff]   ;;  %v1980_v8 = vld [vmem:[#allocation5 + $0x68] sm:$0xff]   ;;  %vm513_vm1 = vcmask 130048  }
  0x3e   :  { %v1974_v2 = vld [vmem:[#allocation5 + $0xf8] sm:$0xff]   ;;  %1686 = vmatpush3.bf16.msra.mxu0 %v1973_v1  ;;  %v1978_v6 = vld [vmem:[#allocation5 + $0xf0] sm:$0xff]   ;;  %v1981_v9 = vld [vmem:[#allocation5 + $0x28] sm:$0xff]  }
  0x3f   :  { %v1975_v3 = vld [vmem:[#allocation5 + $0xb8] sm:$0xff]   ;;  %1707 = vmatprep.subr.bf16.mxu1 %v1974_v2  ;;  %1687 = vmatprep.subr.bf16.mxu0 %v1976_v4  ;;  %v1979_v7 = vld [vmem:[#allocation5 + $0xb0] sm:$0xff]   ;;  %v1982_v10 = vld [vmem:[#allocation5 + $0xe8] sm:$0xff]  }
  0x40   :  { %1708 = vmatpush3.bf16.msra.mxu1 %v1975_v3  ;;  %v1983_v11 = vld [vmem:[#allocation5 + $0xa8] sm:$0xff]   ;;  %v1984_v12 = vld [vmem:[#allocation5 + $0x60] sm:$0xff]   ;;  %v1988_v16 = vld [vmem:[#allocation5 + $0x58] sm:$0xff]  }
  0x41   :  { %1709 = vmatprep.subr.bf16.mxu1 %v1978_v6  ;;  %v1985_v13 = vld [vmem:[#allocation5 + $0x20] sm:$0xff]   ;;  %v1989_v17 = vld [vmem:[#allocation5 + $0x18] sm:$0xff]   ;;  %v1992_v20 = vld [vmem:[#allocation5 + $0x50] sm:$0xff]  }
  0x42   :  { %1688 = vmatpush3.bf16.msra.mxu0 %v1977_v5  ;;  %v1986_v14 = vld [vmem:[#allocation5 + $0xe0] sm:$0xff]   ;;  %v1990_v18 = vld [vmem:[#allocation5 + $0xd8] sm:$0xff]   ;;  %v1993_v21 = vld [vmem:[#allocation5 + $0x10] sm:$0xff]  }
  0x43   :  { %1689 = vmatprep.subr.bf16.mxu0 %v1980_v8  ;;  %v1987_v15 = vld [vmem:[#allocation5 + $0xa0] sm:$0xff]   ;;  %v1991_v19 = vld [vmem:[#allocation5 + $0x98] sm:$0xff]   ;;  %v1994_v22 = vld [vmem:[#allocation5 + $0xd0] sm:$0xff]  }
  0x44   :  { %1710 = vmatpush3.bf16.msra.mxu1 %v1979_v7  ;;  %v1995_v23 = vld [vmem:[#allocation5 + $0x90] sm:$0xff]   ;;  %v1996_v24 = vld [vmem:[#allocation5 + $0x48] sm:$0xff]   ;;  %v2000_v28 = vld [vmem:[#allocation5 + $0x40] sm:$0xff]  }
  0x45   :  { %1711 = vmatprep.subr.bf16.mxu1 %v1982_v10  ;;  %v1997_v25 = vld [vmem:[#allocation5 + $0x8] sm:$0xff]   ;;  %v2001_v29 = vld [vmem:[#allocation5] sm:$0xff]   ;;  %v101_v31 = vld [vmem:[#allocation2 + $0x8] sm:$0xff] }
  0x46   :  { %1690 = vmatpush3.bf16.msra.mxu0 %v1981_v9  ;;  %v1998_v26 = vld [vmem:[#allocation5 + $0xc8] sm:$0xff]   ;;  %v2002_v30 = vld [vmem:[#allocation5 + $0xc0] sm:$0xff]   ;;  %v108_v32 = vpack.c.bf16 %v101_v31, %v101_v31  ;;  %v2004_v36 = vld [vmem:[#allocation5 + $0x178] sm:$0xff]  }
  0x47   :  { %1691 = vmatprep.subr.bf16.mxu0 %v1984_v12  ;;  %v1999_v27 = vld [vmem:[#allocation5 + $0x88] sm:$0xff]   ;;  %v2003_v33 = vld [vmem:[#allocation5 + $0x80] sm:$0xff]   ;;  %v2005_v39 = vld [vmem:[#allocation5 + $0x138] sm:$0xff]  }
  0x48   :  { %1712 = vmatpush3.bf16.msra.mxu1 %v1983_v11  ;;  %v100_v34 = vld [vmem:[#allocation2] sm:$0xff]  ;;  %v103_v37 = vld [vmem:[#allocation2 + $0x18] sm:$0xff]  ;;  %549 = vmatprep.mubr.bf16.mxu0 %v108_v32  ;;  %v102_v40 = vld [vmem:[#allocation2 + $0x10] sm:$0xff] }
  0x49   :  { %1713 = vmatprep.subr.bf16.mxu1 %v1986_v14  ;;  %v107_v35 = vpack.c.bf16 %v100_v34, %v100_v34  ;;  %v110_v38 = vpack.c.bf16 %v103_v37, %v103_v37  ;;  %v109_v41 = vpack.c.bf16 %v102_v40, %v102_v40  ;;  %v2006_v42 = vld [vmem:[#allocation5 + $0x170] sm:$0xff]   ;;  %v2008_v45 = vld [vmem:[#allocation5 + $0x168] sm:$0xff]   ;;  %v2010_v47 = vld [vmem:[#allocation5 + $0x160] sm:$0xff]  }
  0x4a   :  { %1692 = vmatpush3.bf16.msra.mxu0 %v1985_v13  ;;  %v2007_v43 = vld [vmem:[#allocation5 + $0x130] sm:$0xff]   ;;  %v2009_v46 = vld [vmem:[#allocation5 + $0x128] sm:$0xff]   ;;  %v2011_v48 = vld [vmem:[#allocation5 + $0x120] sm:$0xff]  }
  0x4b   :  { %1693 = vmatprep.subr.bf16.mxu0 %v1988_v16  ;;  %589 = vmatprep.mubr.bf16.mxu1 %v110_v38  ;;  %v2012_v49 = vld [vmem:[#allocation5 + $0x158] sm:$0xff]   ;;  %v2014_v51 = vld [vmem:[#allocation5 + $0x150] sm:$0xff]   ;;  %v2020_v53 = vld [vmem:[#allocation5 + $0x180] sm:$0xff]  }
  0x4c   :  { %1714 = vmatpush3.bf16.msra.mxu1 %v1987_v15  ;;  %v2013_v50 = vld [vmem:[#allocation5 + $0x118] sm:$0xff]   ;;  %v2015_v52 = vld [vmem:[#allocation5 + $0x110] sm:$0xff]   ;;  %v2016_v55 = vld [vmem:[#allocation5 + $0x148] sm:$0xff]  }
  0x4d   :  { %1715 = vmatprep.subr.bf16.mxu1 %v1990_v18  ;;  %v105_v54 = vld [vmem:[#allocation2 + $0x28] sm:$0xff]  ;;  %v106_v57 = vld [vmem:[#allocation2 + $0x30] sm:$0xff]  ;;  %v2017_v59 = vld [vmem:[#allocation5 + $0x108] sm:$0xff]  }
  0x4e   :  { %1694 = vmatpush3.bf16.msra.mxu0 %v1989_v17  ;;  %v112_v56 = vpack.c.bf16 %v105_v54, %v105_v54  ;;  %v113_v58 = vpack.c.bf16 %v106_v57, %v106_v57  ;;  %v2018_v60 = vld [vmem:[#allocation5 + $0x140] sm:$0xff]   ;;  %v104_v62 = vld [vmem:[#allocation2 + $0x20] sm:$0xff]  ;;  %v2027_v31 = vld [vmem:[#allocation7 + $0x8] sm:$0xff]  }
  0x4f   :  { %1695 = vmatprep.subr.bf16.mxu0 %v1992_v20  ;;  %v2019_v61 = vld [vmem:[#allocation5 + $0x100] sm:$0xff]   ;;  %v111_v63 = vpack.c.bf16 %v104_v62, %v104_v62  ;;  %v1567_v14 = vld [vmem:[%s2410_s2] ss:$0 sm:$0xff] }
  0x50   :  { %1716 = vmatpush3.bf16.msra.mxu1 %v1991_v19  ;;  %v2021_v0 = vld [vmem:[#allocation7 + $0x38] sm:$0xff]   ;;  %v2028_v32 = vld [vmem:[#allocation7] sm:$0xff]  }
  0x51   :  { %1717 = vmatprep.subr.bf16.mxu1 %v1994_v22  ;;  %v1618_v54 = vld [vmem:[%s2412_s4] ss:$0 sm:$0xff] }
  0x52   :  { %1696 = vmatpush3.bf16.msra.mxu0 %v1993_v21 }
  0x53   :  { %1697 = vmatprep.subr.bf16.mxu0 %v1996_v24 }
  0x54   :  { %1718 = vmatpush3.bf16.msra.mxu1 %v1995_v23 }
  0x55   :  { %1719 = vmatprep.subr.bf16.mxu1 %v1998_v26  ;;  %v2022_v26 = vld [vmem:[#allocation7 + $0x30] sm:$0xff]  }
  0x56   :  { %1698 = vmatpush3.bf16.msra.mxu0 %v1997_v25 }
  0x57   :  { %1699 = vmatprep.subr.bf16.mxu0 %v2000_v28  ;;  %v2024_v28 = vld [vmem:[#allocation7 + $0x20] sm:$0xff]  }
  0x58   :  { %1720 = vmatpush3.bf16.msra.mxu1 %v1999_v27  ;;  %v2023_v27 = vld [vmem:[#allocation7 + $0x28] sm:$0xff]  }
  0x59   :  { %1721 = vmatprep.subr.bf16.mxu1 %v2002_v30  ;;  %v2026_v30 = vld [vmem:[#allocation7 + $0x10] sm:$0xff]  }
  0x5a   :  { %1700 = vmatpush3.bf16.msra.mxu0 %v2001_v29  ;;  %v2025_v29 = vld [vmem:[#allocation7 + $0x18] sm:$0xff]  }
  0x5b   :  { %1729 = vmatprep.subr.bf16.mxu0 %v2004_v36 }
  0x5c   :  { %1722 = vmatpush3.bf16.msra.mxu1 %v2003_v33 }
  0x5d   :  { %550 = vmatmul.mubr.bf16.vlgmr.msra.gmra.mxu0 %v107_v35  ;;  %1816 = vmatprep.subr.bf16.mxu1 %v2228_v44 }
  0x5e   :  { %1730 = vmatpush3.bf16.msra.mxu0 %v2005_v39  ;;  %629 = vmatprep.mubr.bf16.mxu0 %v112_v56 }
  0x5f   :  { %590 = vmatmul.mubr.bf16.vlgmr.msra.gmra.mxu1 %v109_v41  ;;  %1731 = vmatprep.subr.bf16.mxu0 %v2006_v42 }
  0x60   :  { %1818 = vmatprep.mubr.msk.bf16.mxu1 %vm2229_vm0, %v2228_v44  ;;  %1817 = vmatpush3.bf16.msra.mxu1 %v2020_v53  ;;  %v2036_v53 = vld [vmem:[#allocation8] sm:$0xff]  }
  0x61   :  { %1822 = vmatprep.subr.bf16.mxu1 %v2228_v44 }
  0x62   :  { %1732 = vmatpush3.bf16.msra.mxu0 %v2007_v43 }
  0x63   :  { %1733 = vmatprep.subr.bf16.mxu0 %v2008_v45 }
  0x66   :  { %1734 = vmatpush3.bf16.msra.mxu0 %v2009_v46  ;;  %v2029_v46 = vld [vmem:[#allocation8 + $0x38] sm:$0xff]  }
  0x67   :  { %1735 = vmatprep.subr.bf16.mxu0 %v2010_v47  ;;  %1819 = vmatmul.mubr.msk.bf16.vlgmr.msra.gmra.mxu1 %vm513_vm1, %v113_v58  ;;  %v2030_v47 = vld [vmem:[#allocation8 + $0x30] sm:$0xff]  }
  0x68   :  { %1838 = vmatprep.mubr.msk.bf16.mxu1 %vm2229_vm0, %v2228_v44  ;;  %1823 = vmatpush3.bf16.msra.mxu1 %v2021_v0 }
  0x69   :  { %1824 = vmatprep.subr.bf16.mxu1 %v2228_v44 }
  0x6a   :  { %1736 = vmatpush3.bf16.msra.mxu0 %v2011_v48  ;;  %v2031_v48 = vld [vmem:[#allocation8 + $0x28] sm:$0xff]  }
  0x6b   :  { %1737 = vmatprep.subr.bf16.mxu0 %v2012_v49  ;;  %v2032_v49 = vld [vmem:[#allocation8 + $0x20] sm:$0xff]  }
  0x6c   :  { %1825 = vmatpush3.bf16.msra.mxu1 %v2022_v26 }
  0x6d   :  { %1826 = vmatprep.subr.bf16.mxu1 %v2228_v44 }
  0x6e   :  { %1738 = vmatpush3.bf16.msra.mxu0 %v2013_v50  ;;  %v2033_v50 = vld [vmem:[#allocation8 + $0x18] sm:$0xff]  }
  0x6f   :  { %1739 = vmatprep.subr.bf16.mxu0 %v2014_v51  ;;  %v2034_v51 = vld [vmem:[#allocation8 + $0x10] sm:$0xff]  }
  0x70   :  { %1827 = vmatpush3.bf16.msra.mxu1 %v2023_v27 }
  0x71   :  { %1828 = vmatprep.subr.bf16.mxu1 %v2228_v44 }
  0x72   :  { %1740 = vmatpush3.bf16.msra.mxu0 %v2015_v52  ;;  %v2035_v52 = vld [vmem:[#allocation8 + $0x8] sm:$0xff]  }
  0x73   :  { %1741 = vmatprep.subr.bf16.mxu0 %v2016_v55 }
  0x74   :  { %1829 = vmatpush3.bf16.msra.mxu1 %v2024_v28 }
  0x75   :  { %1830 = vmatprep.subr.bf16.mxu1 %v2228_v44 }
  0x76   :  { %1742 = vmatpush3.bf16.msra.mxu0 %v2017_v59 }
  0x77   :  { %1743 = vmatprep.subr.bf16.mxu0 %v2018_v60 }
  0x78   :  { %1831 = vmatpush3.bf16.msra.mxu1 %v2025_v29 }
  0x79   :  { %1832 = vmatprep.subr.bf16.mxu1 %v2228_v44 }
  0x7a   :  { %1744 = vmatpush3.bf16.msra.mxu0 %v2019_v61 }
  0x7b   :  { %1842 = vmatprep.subr.bf16.mxu0 %v2228_v44 }
  0x7c   :  { %1833 = vmatpush3.bf16.msra.mxu1 %v2026_v30 }
  0x7d   :  { %630 = vmatmul.mubr.bf16.vlgmr.msra.gmra.mxu0 %v111_v63  ;;  %1834 = vmatprep.subr.bf16.mxu1 %v2228_v44 }
  0x7e   :  { %1858 = vmatprep.mubr.msk.bf16.mxu0 %vm2229_vm0, %v2228_v44  ;;  %1843 = vmatpush3.bf16.msra.mxu0 %v2029_v46 }
  0x7f   :  { %1844 = vmatprep.subr.bf16.mxu0 %v2228_v44 }
  0x80   :  { %1835 = vmatpush3.bf16.msra.mxu1 %v2027_v31 }
  0x81   :  { %1836 = vmatprep.subr.bf16.mxu1 %v2228_v44 }
  0x82   :  { %1845 = vmatpush3.bf16.msra.mxu0 %v2030_v47 }
  0x83   :  { %1846 = vmatprep.subr.bf16.mxu0 %v2228_v44 }
  0x84   :  { %1837 = vmatpush3.bf16.msra.mxu1 %v2028_v32 }
  0x85   :  { %1862 = vmatprep.subr.bf16.mxu1 %v2228_v44 }
  0x86   :  { %1847 = vmatpush3.bf16.msra.mxu0 %v2031_v48 }
  0x87   :  { %1848 = vmatprep.subr.bf16.mxu0 %v2228_v44 }
  0x8a   :  { %1849 = vmatpush3.bf16.msra.mxu0 %v2032_v49 }
  0x8b   :  { %1850 = vmatprep.subr.bf16.mxu0 %v2228_v44 }
  0x8e   :  { %1851 = vmatpush3.bf16.msra.mxu0 %v2033_v50 }
  0x8f   :  { %1852 = vmatprep.subr.bf16.mxu0 %v2228_v44 }
  0x92   :  { %1853 = vmatpush3.bf16.msra.mxu0 %v2034_v51 }
  0x93   :  { %1854 = vmatprep.subr.bf16.mxu0 %v2228_v44 }
  0x96   :  { %1855 = vmatpush3.bf16.msra.mxu0 %v2035_v52 }
  0x97   :  { %1856 = vmatprep.subr.bf16.mxu0 %v2228_v44 }
  0x9a   :  { %1857 = vmatpush3.bf16.msra.mxu0 %v2036_v53 }
  0x9b   :  { %1882 = vmatprep.subr.bf16.mxu0 %v2228_v44 }
 0x11d   :  { %v1701_v1 = vpop.f32.mrf.mxu0 }
 0x11f   :  { %v1702_v2 = vpop.f32.mrf.mxu0  ;;  %v1723_v3 = vpop.f32.mrf.mxu1 }
 0x120   :  { %v1703_v13 = vadd.f32 %v1702_v2, %v1701_v1 }
 0x121   :  { %v1704_v4 = vpop.f32.mrf.mxu0  ;;  %v1724_v5 = vpop.f32.mrf.mxu1 }
 0x122   :  { %v552_v15 = vadd.f32 %v1703_v13, %v1567_v14  ;;  %v1725_v16 = vadd.f32 %v1724_v5, %v1723_v3  ;;  %v2038_v14 = vld [vmem:[#allocation7 + $0x70] sm:$0xff]  }
 0x123   :  { %v1705_v6 = vpop.f32.mrf.mxu0  ;;  %v1726_v7 = vpop.f32.mrf.mxu1 }
 0x124   :  { %v592_v19 = vadd.f32 %v1725_v16, %v552_v15  ;;  %v2037_v6 = vld [vmem:[#allocation7 + $0x78] sm:$0xff]   ;;  %v1627_v7 = vld [vmem:[%s2414_s6] ss:$0 sm:$0xff]  ;;  %v2039_v15 = vld [vmem:[#allocation7 + $0x68] sm:$0xff]  }
 0x125   :  { %v1727_v8 = vpop.f32.mrf.mxu1  ;;  %v2040_v16 = vld [vmem:[#allocation7 + $0x60] sm:$0xff]  }
 0x127   :  { %v671_v9 = vpop.f32.mrf.mxu1 }
 0x129   :  { %v1820_v10 = vpop.f32.mrf.mxu1 }
 0x12b   :  { %v674_v11 = vpop.f32.mrf.mxu1 }
 0x12d   :  { %v1821_v12 = vpop.f32.mrf.mxu1 }
 0x13d   :  { %v1745_v17 = vpop.f32.mrf.mxu0 }
 0x13f   :  { %v1746_v18 = vpop.f32.mrf.mxu0 }
 0x140   :  { %v1747_v20 = vadd.f32 %v1746_v18, %v1745_v17  ;;  %v2041_v17 = vld [vmem:[#allocation7 + $0x58] sm:$0xff]   ;;  %v2042_v18 = vld [vmem:[#allocation7 + $0x50] sm:$0xff]  }
 0x141   :  { %v1748_v21 = vpop.f32.mrf.mxu0 }
 0x142   :  { %v632_v22 = vadd.f32 %v1747_v20, %v592_v19  ;;  %v2043_v19 = vld [vmem:[#allocation7 + $0x48] sm:$0xff]   ;;  %v2044_v20 = vld [vmem:[#allocation7 + $0x40] sm:$0xff]  }
 0x143   :  { %v1749_v23 = vpop.f32.mrf.mxu0 }
 0x144   :  { %v672_v24 = vadd.f32 %v671_v9, %v632_v22 }
 0x146   :  { %677 = vadd.xlane.f32.xlu0 %v672_v24  ;;  %v681_v25 = vmul.f32 %v672_v24, %v672_v24 }
 0x14a   :  { %682 = vadd.xlane.f32.xlu0 %v681_v25 }
 0x1cf   :  { %v678_v33 = vpop.xlane.xlu0 %677 }
 0x1d0   :  { %v680_v34 = vmul.f32 0.0078125, %v678_v33  ;;  %v2045_v33 = vld [vmem:[#allocation8 + $0x78] sm:$0xff]  }
 0x1d2   :  { %v685_v36 = vmul.f32 %v680_v34, %v680_v34  ;;  %v688_v41 = vsub.f32 %v672_v24, %v680_v34  ;;  %v2046_v34 = vld [vmem:[#allocation8 + $0x70] sm:$0xff]  }
 0x1d3   :  { %v683_v35 = vpop.xlane.xlu0 %682 }
 0x1d4   :  { %v684_v37 = vmul.f32 0.0078125, %v683_v35  ;;  %v2047_v35 = vld [vmem:[#allocation8 + $0x68] sm:$0xff]  }
 0x1d6   :  { %v686_v38 = vsub.f32 %v684_v37, %v685_v36  ;;  %v2048_v36 = vld [vmem:[#allocation8 + $0x60] sm:$0xff]   ;;  %v2049_v37 = vld [vmem:[#allocation8 + $0x58] sm:$0xff]  }
 0x1d8   :  { %v687_v39 = vmax.f32 %v686_v38, 0.0  ;;  %v2050_v38 = vld [vmem:[#allocation8 + $0x50] sm:$0xff]  }
 0x1da   :  { %v689_v40 = vadd.f32 1e-05, %v687_v39  ;;  %v2051_v39 = vld [vmem:[#allocation8 + $0x48] sm:$0xff]  }
 0x1dc   :  { %2077 = vrsqrt.f32 %v689_v40  ;;  %v2052_v40 = vld [vmem:[#allocation8 + $0x40] sm:$0xff]  }
 0x1e9   :  { %v2078_v42 = vpop.eup %2077 }
 0x1ea   :  { %v691_v43 = vmul.f32 %v2078_v42, %v688_v41  ;;  %v1637_v41 = vld [vmem:[%s2412_s4 + $0x1] ss:$0 sm:$0xff] }
 0x1ec   :  { %v692_v45 = vpack.c.bf16 %v691_v43, %v691_v43 }
 0x1ee   :  { %1839 = vmatmul.mubr.bf16.vlgmr.msra.gmra.mxu1 %v692_v45 }
 0x1ef   :  { %1878 = vmatprep.mubr.msk.bf16.mxu1 %vm2229_vm0, %v2228_v44  ;;  %1863 = vmatpush3.bf16.msra.mxu1 %v2037_v6  ;;  %v2058_v6 = vld [vmem:[#allocation7 + $0x90] sm:$0xff]  }
 0x1f0   :  { %1864 = vmatprep.subr.bf16.mxu1 %v2228_v44 }
 0x1f3   :  { %1865 = vmatpush3.bf16.msra.mxu1 %v2038_v14 }
 0x1f4   :  { %1866 = vmatprep.subr.bf16.mxu1 %v2228_v44 }
 0x1f7   :  { %1867 = vmatpush3.bf16.msra.mxu1 %v2039_v15 }
 0x1f8   :  { %1868 = vmatprep.subr.bf16.mxu1 %v2228_v44 }
 0x1fb   :  { %1869 = vmatpush3.bf16.msra.mxu1 %v2040_v16 }
 0x1fc   :  { %1870 = vmatprep.subr.bf16.mxu1 %v2228_v44 }
 0x1ff   :  { %1871 = vmatpush3.bf16.msra.mxu1 %v2041_v17 }
 0x200   :  { %1872 = vmatprep.subr.bf16.mxu1 %v2228_v44 }
 0x203   :  { %1873 = vmatpush3.bf16.msra.mxu1 %v2042_v18 }
 0x204   :  { %1874 = vmatprep.subr.bf16.mxu1 %v2228_v44 }
 0x207   :  { %1875 = vmatpush3.bf16.msra.mxu1 %v2043_v19 }
 0x208   :  { %1876 = vmatprep.subr.bf16.mxu1 %v2228_v44 }
 0x20b   :  { %1877 = vmatpush3.bf16.msra.mxu1 %v2044_v20 }
 0x20c   :  { %1902 = vmatprep.subr.bf16.mxu1 %v2228_v44 }
 0x2ae   :  { %v798_v55 = vpop.f32.mrf.mxu1 }
 0x2af   :  { %v799_v56 = vadd.f32 %v1618_v54, %v798_v55 }
 0x2b0   :  { %v1840_v57 = vpop.f32.mrf.mxu1 }
 0x2b1   :  { %v805_v58 = vmul.f32 0.044715, %v799_v56  ;;  %v804_v2 = vmul.f32 0.5, %v799_v56 }
 0x2b2   :  { %v801_v59 = vpop.f32.mrf.mxu1 }
 0x2b3   :  { %v806_v60 = vmul.f32 %v805_v58, %v799_v56  ;;  %v2053_v58 = vld [vmem:[#allocation7 + $0xb8] sm:$0xff]   ;;  %v1647_v59 = vld [vmem:[%s2414_s6 + $0x1] ss:$0 sm:$0xff] }
 0x2b4   :  { %v1841_v61 = vpop.f32.mrf.mxu1 }
 0x2b5   :  { %v807_v62 = vmul.f32 %v806_v60, %v799_v56 }
 0x2b7   :  { %v808_v63 = vadd.f32 %v807_v62, %v799_v56 }
 0x2b9   :  { %v809_v0 = vmul.f32 0.7978846, %v808_v63 }
 0x2bb   :  { %2079 = vtanh.f32 %v809_v0 }
 0x2c8   :  { %v2080_v1 = vpop.eup %2079 }
 0x2c9   :  { %v811_v3 = vadd.f32 1.0, %v2080_v1 }
 0x2cb   :  { %v812_v4 = vmul.f32 %v811_v3, %v804_v2  ;;  %v2054_v2 = vld [vmem:[#allocation7 + $0xb0] sm:$0xff]   ;;  %v2055_v3 = vld [vmem:[#allocation7 + $0xa8] sm:$0xff]  }
 0x2cd   :  { %v813_v5 = vpack.c.bf16 %v812_v4, %v812_v4  ;;  %v2056_v4 = vld [vmem:[#allocation7 + $0xa0] sm:$0xff]  }
 0x2cf   :  { %1859 = vmatmul.mubr.bf16.vlgmr.msra.gmra.mxu0 %v813_v5  ;;  %v2057_v5 = vld [vmem:[#allocation7 + $0x98] sm:$0xff]  }
 0x2d0   :  { %1898 = vmatprep.mubr.msk.bf16.mxu0 %vm2229_vm0, %v2228_v44  ;;  %1883 = vmatpush3.bf16.msra.mxu0 %v2045_v33  ;;  %v2073_v33 = vld [vmem:[#allocation10 + $0x18] sm:$0xff]  }
 0x2d1   :  { %1884 = vmatprep.subr.bf16.mxu0 %v2228_v44 }
 0x2d4   :  { %1885 = vmatpush3.bf16.msra.mxu0 %v2046_v34  ;;  %v2074_v34 = vld [vmem:[#allocation10 + $0x10] sm:$0xff]  }
 0x2d5   :  { %1886 = vmatprep.subr.bf16.mxu0 %v2228_v44 }
 0x2d8   :  { %1887 = vmatpush3.bf16.msra.mxu0 %v2047_v35  ;;  %v2075_v35 = vld [vmem:[#allocation10 + $0x8] sm:$0xff]  }
 0x2d9   :  { %1888 = vmatprep.subr.bf16.mxu0 %v2228_v44 }
 0x2dc   :  { %1889 = vmatpush3.bf16.msra.mxu0 %v2048_v36  ;;  %v1657_v36 = vld [vmem:[%s2412_s4 + $0x2] ss:$0 sm:$0xff] }
 0x2dd   :  { %1890 = vmatprep.subr.bf16.mxu0 %v2228_v44 }
 0x2e0   :  { %1891 = vmatpush3.bf16.msra.mxu0 %v2049_v37 }
 0x2e1   :  { %1892 = vmatprep.subr.bf16.mxu0 %v2228_v44 }
 0x2e4   :  { %1893 = vmatpush3.bf16.msra.mxu0 %v2050_v38 }
 0x2e5   :  { %1894 = vmatprep.subr.bf16.mxu0 %v2228_v44 }
 0x2e8   :  { %1895 = vmatpush3.bf16.msra.mxu0 %v2051_v39 }
 0x2e9   :  { %1896 = vmatprep.subr.bf16.mxu0 %v2228_v44 }
 0x2ec   :  { %1897 = vmatpush3.bf16.msra.mxu0 %v2052_v40 }
 0x2ed   :  { %1922 = vmatprep.subr.bf16.mxu0 %v2228_v44 }
 0x38f   :  { %v919_v8 = vpop.f32.mrf.mxu0 }
 0x390   :  { %v920_v9 = vadd.f32 %v1627_v7, %v919_v8  ;;  %v2059_v7 = vld [vmem:[#allocation7 + $0x88] sm:$0xff]   ;;  %v2060_v8 = vld [vmem:[#allocation7 + $0x80] sm:$0xff]  }
 0x391   :  { %v1860_v10 = vpop.f32.mrf.mxu0 }
 0x392   :  { %925 = vadd.xlane.f32.xlu1 %v920_v9  ;;  %v928_v12 = vmul.f32 %v920_v9, %v920_v9 }
 0x393   :  { %v922_v11 = vpop.f32.mrf.mxu0 }
 0x395   :  { %v1861_v13 = vpop.f32.mrf.mxu0 }
 0x396   :  { %929 = vadd.xlane.f32.xlu1 %v928_v12 }
 0x41b   :  { %v926_v21 = vpop.xlane.xlu1 %925 }
 0x41c   :  { %v927_v22 = vmul.f32 0.0078125, %v926_v21  ;;  %v2061_v21 = vld [vmem:[#allocation8 + $0xb8] sm:$0xff]  }
 0x41e   :  { %v932_v24 = vmul.f32 %v927_v22, %v927_v22  ;;  %v935_v29 = vsub.f32 %v920_v9, %v927_v22  ;;  %v2062_v22 = vld [vmem:[#allocation8 + $0xb0] sm:$0xff]  }
 0x41f   :  { %v930_v23 = vpop.xlane.xlu1 %929 }
 0x420   :  { %v931_v25 = vmul.f32 0.0078125, %v930_v23  ;;  %v2063_v23 = vld [vmem:[#allocation8 + $0xa8] sm:$0xff]  }
 0x422   :  { %v933_v26 = vsub.f32 %v931_v25, %v932_v24  ;;  %v2064_v24 = vld [vmem:[#allocation8 + $0xa0] sm:$0xff]   ;;  %v2065_v25 = vld [vmem:[#allocation8 + $0x98] sm:$0xff]  }
 0x424   :  { %v934_v27 = vmax.f32 %v933_v26, 0.0  ;;  %v2066_v26 = vld [vmem:[#allocation8 + $0x90] sm:$0xff]  }
 0x426   :  { %v936_v28 = vadd.f32 1e-05, %v934_v27  ;;  %v2067_v27 = vld [vmem:[#allocation8 + $0x88] sm:$0xff]  }
 0x428   :  { %2081 = vrsqrt.f32 %v936_v28  ;;  %v2068_v28 = vld [vmem:[#allocation8 + $0x80] sm:$0xff]  }
 0x435   :  { %v2082_v30 = vpop.eup %2081 }
 0x436   :  { %v938_v31 = vmul.f32 %v2082_v30, %v935_v29  ;;  %v2069_v29 = vld [vmem:[#allocation10 + $0x38] sm:$0xff]   ;;  %v2070_v30 = vld [vmem:[#allocation10 + $0x30] sm:$0xff]  }
 0x438   :  { %v939_v32 = vpack.c.bf16 %v938_v31, %v938_v31  ;;  %v2071_v31 = vld [vmem:[#allocation10 + $0x28] sm:$0xff]  }
 0x43a   :  { %1879 = vmatmul.mubr.bf16.vlgmr.msra.gmra.mxu1 %v939_v32  ;;  %v2072_v32 = vld [vmem:[#allocation10 + $0x20] sm:$0xff]  }
 0x43b   :  { %1918 = vmatprep.mubr.msk.bf16.mxu1 %vm2229_vm0, %v2228_v44  ;;  %1903 = vmatpush3.bf16.msra.mxu1 %v2053_v58 }
 0x43c   :  { %1904 = vmatprep.subr.bf16.mxu1 %v2228_v44 }
 0x43f   :  { %1905 = vmatpush3.bf16.msra.mxu1 %v2054_v2 }
 0x440   :  { %1906 = vmatprep.subr.bf16.mxu1 %v2228_v44 }
 0x443   :  { %1907 = vmatpush3.bf16.msra.mxu1 %v2055_v3 }
 0x444   :  { %1908 = vmatprep.subr.bf16.mxu1 %v2228_v44 }
 0x447   :  { %1909 = vmatpush3.bf16.msra.mxu1 %v2056_v4 }
 0x448   :  { %1910 = vmatprep.subr.bf16.mxu1 %v2228_v44 }
 0x44b   :  { %1911 = vmatpush3.bf16.msra.mxu1 %v2057_v5 }
 0x44c   :  { %1912 = vmatprep.subr.bf16.mxu1 %v2228_v44 }
 0x44f   :  { %1913 = vmatpush3.bf16.msra.mxu1 %v2058_v6 }
 0x450   :  { %1914 = vmatprep.subr.bf16.mxu1 %v2228_v44 }
 0x453   :  { %1915 = vmatpush3.bf16.msra.mxu1 %v2059_v7 }
 0x454   :  { %1916 = vmatprep.subr.bf16.mxu1 %v2228_v44 }
 0x457   :  { %1917 = vmatpush3.bf16.msra.mxu1 %v2060_v8 }
 0x458   :  { %1942 = vmatprep.subr.bf16.mxu1 %v2228_v44 }
 0x4fa   :  { %v1047_v42 = vpop.f32.mrf.mxu1 }
 0x4fb   :  { %v1048_v43 = vadd.f32 %v1637_v41, %v1047_v42 }
 0x4fc   :  { %v1880_v45 = vpop.f32.mrf.mxu1 }
 0x4fd   :  { %v1054_v46 = vmul.f32 0.044715, %v1048_v43  ;;  %v1053_v54 = vmul.f32 0.5, %v1048_v43 }
 0x4fe   :  { %v1050_v47 = vpop.f32.mrf.mxu1 }
 0x4ff   :  { %v1055_v48 = vmul.f32 %v1054_v46, %v1048_v43 }
 0x500   :  { %v1881_v49 = vpop.f32.mrf.mxu1 }
 0x501   :  { %v1056_v50 = vmul.f32 %v1055_v48, %v1048_v43 }
 0x503   :  { %v1057_v51 = vadd.f32 %v1056_v50, %v1048_v43 }
 0x505   :  { %v1058_v52 = vmul.f32 0.7978846, %v1057_v51 }
 0x507   :  { %2083 = vtanh.f32 %v1058_v52  ;;  %v2076_v52 = vld [vmem:[#allocation10] sm:$0xff]  }
 0x514   :  { %v2084_v53 = vpop.eup %2083 }
 0x515   :  { %v1060_v55 = vadd.f32 1.0, %v2084_v53  ;;  %v1667_v53 = vld [vmem:[%s2414_s6 + $0x2] ss:$0 sm:$0xff]  ;;  %s2230_s6 = smov [#allocation11]  }
 0x516   :  { %s1556_s23 = sshll.u32 %s2230_s6, 4  ;;  %s1557_s23 = int_to_ptr.vmem [resolvable:$true] %s1556_s23 }
 0x517   :  { %v1061_v56 = vmul.f32 %v1060_v55, %v1053_v54  ;;  %p2198_p12 = scmp.lt.s32.totalorder %s1557_s23, %s1557_s23 }
 0x519   :  { %v1062_v57 = vpack.c.bf16 %v1061_v56, %v1061_v56 }
 0x51b   :  { %1899 = vmatmul.mubr.bf16.vlgmr.msra.gmra.mxu0 %v1062_v57 }
 0x51c   :  { %1938 = vmatprep.mubr.msk.bf16.mxu0 %vm2229_vm0, %v2228_v44  ;;  %1923 = vmatpush3.bf16.msra.mxu0 %v2061_v21 }
 0x51d   :  { %1924 = vmatprep.subr.bf16.mxu0 %v2228_v44 }
 0x520   :  { %1925 = vmatpush3.bf16.msra.mxu0 %v2062_v22 }
 0x521   :  { %1926 = vmatprep.subr.bf16.mxu0 %v2228_v44 }
 0x524   :  { %1927 = vmatpush3.bf16.msra.mxu0 %v2063_v23 }
 0x525   :  { %1928 = vmatprep.subr.bf16.mxu0 %v2228_v44 }
 0x528   :  { %1929 = vmatpush3.bf16.msra.mxu0 %v2064_v24 }
 0x529   :  { %1930 = vmatprep.subr.bf16.mxu0 %v2228_v44 }
 0x52c   :  { %1931 = vmatpush3.bf16.msra.mxu0 %v2065_v25 }
 0x52d   :  { %1932 = vmatprep.subr.bf16.mxu0 %v2228_v44 }
 0x530   :  { %1933 = vmatpush3.bf16.msra.mxu0 %v2066_v26 }
 0x531   :  { %1934 = vmatprep.subr.bf16.mxu0 %v2228_v44 }
 0x534   :  { %1935 = vmatpush3.bf16.msra.mxu0 %v2067_v27 }
 0x535   :  { %1936 = vmatprep.subr.bf16.mxu0 %v2228_v44 }
 0x538   :  { %1937 = vmatpush3.bf16.msra.mxu0 %v2068_v28 }
 0x5db   :  { %v1170_v60 = vpop.f32.mrf.mxu0 }
 0x5dc   :  { %v1171_v61 = vadd.f32 %v1647_v59, %v1170_v60  ;;  %v1676_v60 = vld [vmem:[%s2416_s8] ss:$0 sm:$0xff]  ;;  %s2193_s8 = scalar_lea.vmem %s1557_s23, 128 }
 0x5dd   :  { %v1900_v62 = vpop.f32.mrf.mxu0  ;;  %p2194_p11 = scmp.ne.s32.totalorder %s1557_s23, %s2193_s8  ;;  %p2199_p13 = scmp.lt.s32.totalorder %s2193_s8, %s2193_s8 }
 0x5de   :  { %1176 = vadd.xlane.f32.xlu0 %v1171_v61  ;;  %v1179_v63 = vmul.f32 %v1171_v61, %v1171_v61 }
 0x5df   :  { %v1173_v0 = vpop.f32.mrf.mxu0  ;;  %p2200_p0 = por %p2199_p13, %p2198_p12 }
 0x5e0   :  { %1180 = vadd.xlane.f32.xlu1 %v1179_v63 }
 0x5e1   :  { %v1901_v1 = vpop.f32.mrf.mxu0  ;;  %p2201_p1 = pnand %p2200_p0, %p2194_p11 }
 0x667   :  { %v1177_v9 = vpop.xlane.xlu0 %1176 }
 0x668   :  { %v1178_v10 = vmul.f32 0.0078125, %v1177_v9 }
 0x669   :  { %v1181_v11 = vpop.xlane.xlu1 %1180 }
 0x66a   :  { %v1183_v12 = vmul.f32 %v1178_v10, %v1178_v10  ;;  %v1182_v13 = vmul.f32 0.0078125, %v1181_v11  ;;  %v1186_v17 = vsub.f32 %v1171_v61, %v1178_v10 }
 0x66c   :  { %v1184_v14 = vsub.f32 %v1182_v13, %v1183_v12 }
 0x66e   :  { %v1185_v15 = vmax.f32 %v1184_v14, 0.0 }
 0x670   :  { %v1187_v16 = vadd.f32 1e-05, %v1185_v15 }
 0x672   :  { %2085 = vrsqrt.f32 %v1187_v16 }
 0x67f   :  { %v2086_v18 = vpop.eup %2085 }
 0x680   :  { %v1189_v19 = vmul.f32 %v2086_v18, %v1186_v17 }
 0x682   :  { %v1190_v20 = vpack.c.bf16 %v1189_v19, %v1189_v19 }
 0x684   :  { %1919 = vmatmul.mubr.bf16.vlgmr.msra.gmra.mxu1 %v1190_v20 }
 0x685   :  { %1958 = vmatprep.mubr.msk.bf16.mxu1 %vm2229_vm0, %v2228_v44  ;;  %1943 = vmatpush3.bf16.msra.mxu1 %v2069_v29 }
 0x686   :  { %1944 = vmatprep.subr.bf16.mxu1 %v2228_v44 }
 0x689   :  { %1945 = vmatpush3.bf16.msra.mxu1 %v2070_v30 }
 0x68a   :  { %1946 = vmatprep.subr.bf16.mxu1 %v2228_v44 }
 0x68d   :  { %1947 = vmatpush3.bf16.msra.mxu1 %v2071_v31 }
 0x68e   :  { %1948 = vmatprep.subr.bf16.mxu1 %v2228_v44 }
 0x691   :  { %1949 = vmatpush3.bf16.msra.mxu1 %v2072_v32 }
 0x692   :  { %1950 = vmatprep.subr.bf16.mxu1 %v2228_v44 }
 0x695   :  { %1951 = vmatpush3.bf16.msra.mxu1 %v2073_v33 }
 0x696   :  { %1952 = vmatprep.subr.bf16.mxu1 %v2228_v44 }
 0x699   :  { %1953 = vmatpush3.bf16.msra.mxu1 %v2074_v34 }
 0x69a   :  { %1954 = vmatprep.subr.bf16.mxu1 %v2228_v44 }
 0x69d   :  { %1955 = vmatpush3.bf16.msra.mxu1 %v2075_v35 }
 0x69e   :  { %1956 = vmatprep.subr.bf16.mxu1 %v2228_v44 }
 0x6a1   :  { %1957 = vmatpush3.bf16.msra.mxu1 %v2076_v52 }
 0x744   :  { %v1298_v37 = vpop.f32.mrf.mxu1 }
 0x745   :  { %v1299_v38 = vadd.f32 %v1657_v36, %v1298_v37 }
 0x746   :  { %v1920_v39 = vpop.f32.mrf.mxu1 }
 0x747   :  { %v1305_v40 = vmul.f32 0.044715, %v1299_v38  ;;  %v1304_v49 = vmul.f32 0.5, %v1299_v38 }
 0x748   :  { %v1301_v41 = vpop.f32.mrf.mxu1 }
 0x749   :  { %v1306_v42 = vmul.f32 %v1305_v40, %v1299_v38 }
 0x74a   :  { %v1921_v43 = vpop.f32.mrf.mxu1 }
 0x74b   :  { %v1307_v45 = vmul.f32 %v1306_v42, %v1299_v38 }
 0x74d   :  { %v1308_v46 = vadd.f32 %v1307_v45, %v1299_v38 }
 0x74f   :  { %v1309_v47 = vmul.f32 0.7978846, %v1308_v46 }
 0x751   :  { %2087 = vtanh.f32 %v1309_v47 }
 0x75e   :  { %v2088_v48 = vpop.eup %2087 }
 0x75f   :  { %v1311_v50 = vadd.f32 1.0, %v2088_v48 }
 0x761   :  { %v1312_v51 = vmul.f32 %v1311_v50, %v1304_v49 }
 0x763   :  { %v1313_v44 = vpack.c.bf16 %v1312_v51, %v1312_v51 }
 0x765   :  { %1939 = vmatmul.mubr.bf16.vlgmr.msra.gmra.mxu0 %v1313_v44 }
 0x825   :  { %v1421_v54 = vpop.f32.mrf.mxu0 }
 0x826   :  { %v1422_v55 = vadd.f32 %v1667_v53, %v1421_v54 }
 0x827   :  { %v1940_v56 = vpop.f32.mrf.mxu0 }
 0x828   :  { %v1427_v57 = vpack.c.bf16 %v1422_v55, %v1422_v55 }
 0x829   :  { %v1424_v58 = vpop.f32.mrf.mxu0 }
 0x82a   :  { %1959 = vmatmul.mubr.bf16.vlgmr.msra.gmra.mxu1 %v1427_v57 }
 0x82b   :  { %v1941_v59 = vpop.f32.mrf.mxu0 }
 0x8ea   :  { %v1533_v61 = vpop.f32.mrf.mxu1 }
 0x8eb   :  { %v1534_v62 = vadd.f32 %v1676_v60, %v1533_v61 }
 0x8ec   :  { %v1960_v63 = vpop.f32.mrf.mxu1 }
 0x8ed   :  { %1539 = vmax.xlane.f32.xlu0 %v1534_v62 }
 0x8ee   :  { %v1536_v0 = vpop.f32.mrf.mxu1 }
 0x8f0   :  { %v1961_v1 = vpop.f32.mrf.mxu1 }
 0x976   :  { %v1540_v2 = vpop.xlane.xlu0 %1539 }
 0x977   :  { %v1541_v3 = vsub.f32 %v1534_v62, %v1540_v2 }
 0x979   :  { %v1542_v4 = vmul.f32 1.442695, %v1541_v3 }
 0x97b   :  { %2089 = vpow2.f32 %v1542_v4 }
 0x988   :  { %v2090_v5 = vpop.eup %2089 }
 0x989   :  { %1544 = vadd.xlane.f32.xlu1 %v2090_v5 }
 0xa12   :  { %v1545_v6 = vpop.xlane.xlu1 %1544 }
 0xa13   :  { %2091 = vlog2.f32 %v1545_v6 }
 0xa20   :  { %v2092_v7 = vpop.eup %2091 }
 0xa21   :  { %v1547_v8 = vmul.f32 0.6931472, %v2092_v7 }
 0xa23   :  { %v1548_v9 = vsub.f32 %v1541_v3, %v1547_v8 }
 0xa25   :  { %1549 = vst [vmem:[#allocation11] sm:$0xff] %v1548_v9 }
 0xa26   :  { %2204 = shalt.err (!%p2201_p1)
}
 0xa27   :  { %1559 = dma.vmem_to_hbm [thread:$0]  %s1557_s23, 128, %s2417_s9, [#allocation4]  }
 0xa28   :  { %2219 = dma.done.wait [#allocation4], 128  }
 0xa29   :  { %2220 = vsyncadd [#allocation4], 4294967168 }
 0xa2a   :  { %1563 = vsyncpa [#allocation3], 1 }
 0xa2b   :  { %1564 = vsyncpa [#allocation6], 1 }
 0xa2c   :  { %1565 = vsyncpa [#allocation9], 1 }
 0xa2d   :  { %1566 = vsyncpa [#allocation4], 1 }

</bundles_post_ra>
